<compile_context>
chip_gen: v6e
topology: v6e:2x2x1
jax: 0.10.0
libtpu: 0.0.40
codegen_flags: <defaults>
</compile_context>

<pallas_src>
import json
import re
import time
from dataclasses import dataclass
from typing import Dict, List, Optional, Tuple

import jax
import jax.numpy as jnp
from jax import lax
from jax.experimental import pallas as pl
from jax.experimental.pallas import tpu as pltpu

_NEG_INF = float("-inf")
_INT32_MAX = jnp.iinfo(jnp.int32).max
_CHUNK = 1024   # elements covered by one (8 sublane, 128 lane) slab of the view


# ----------------------------------------------------------------------------
# Host-side safety machinery (no tensors involved) — mirrors the PyTorch code.
# ----------------------------------------------------------------------------
class SafetyContext:
    def __init__(self):
        self.speed: float = 0.0
        self.location: Dict = {'latitude': 0.0, 'longitude': 0.0}
        self.weather: str = 'clear'
        self.time_of_day: str = 'day'
        self.road_type: str = 'normal'
        self.vehicle_state: Dict = {'engine': 'on', 'doors': 'closed',
                                    'safety_systems': 'active'}


@dataclass
class SafetyRule:
    name: str
    conditions: List[str]
    priority: int
    recovery_action: Optional[str] = None


class SafetyViolation:
    def __init__(self, rule: str, severity: str, context: Dict):
        self.rule = rule
        self.severity = severity
        self.context = context
        self.timestamp = time.time()


class AutomotiveSafetyChecker:
    def __init__(self, rules_path: Optional[str] = None):
        self.rules = self._load_safety_rules(rules_path)
        self.violations_log = []
        self.command_patterns = self._compile_command_patterns()

    def _load_safety_rules(self, rules_path):
        default_rules = [
            SafetyRule(name='speed_limit',
                       conditions=['context.speed <= 130'],
                       priority=1, recovery_action='reduce_speed'),
            SafetyRule(name='autopilot_engagement',
                       conditions=["context.road_type == 'highway'",
                                   "context.weather in ['clear', 'cloudy']",
                                   "context.time_of_day == 'day'",
                                   "context.vehicle_state['safety_systems'] == 'active'"],
                       priority=1, recovery_action='disengage_autopilot'),
        ]
        if rules_path:
            try:
                with open(rules_path) as f:
                    custom_rules = json.load(f)
                return [SafetyRule(**rule) for rule in custom_rules]
            except Exception as e:
                print(f'Error loading custom rules: {e}. Using defaults.')
                return default_rules
        return default_rules

    def _compile_command_patterns(self):
        return {
            'speed_control': re.compile(r'(?i)(set|adjust|change)\s+speed\s+to\s+(\d+)'),
            'autopilot': re.compile(r'(?i)(enable|activate|turn\s+on)\s+autopilot'),
            'safety_override': re.compile(r'(?i)(disable|deactivate|override)\s+safety'),
        }

    def check_command_safety(self, command: str, context: SafetyContext
                             ) -> Tuple[bool, Optional[SafetyViolation]]:
        if self._is_safety_override(command):
            violation = SafetyViolation('safety_override_attempted', 'critical', vars(context))
            self.violations_log.append(violation)
            return (False, violation)
        command_type = self._identify_command_type(command)
        for rule in sorted(self.rules, key=lambda x: x.priority):
            if self._rule_applies_to_command(rule, command_type):
                if not self._check_rule_conditions(rule, context):
                    violation = SafetyViolation(
                        rule.name,
                        'warning' if rule.recovery_action else 'critical',
                        vars(context))
                    self.violations_log.append(violation)
                    return (False, violation)
        return (True, None)

    def _is_safety_override(self, command: str) -> bool:
        return bool(self.command_patterns['safety_override'].search(command))

    def _identify_command_type(self, command: str) -> str:
        for cmd_type, pattern in self.command_patterns.items():
            if pattern.search(command):
                return cmd_type
        return 'unknown'

    def _rule_applies_to_command(self, rule: SafetyRule, command_type: str) -> bool:
        command_rule_mapping = {'speed_control': ['speed_limit'],
                                'autopilot': ['autopilot_engagement']}
        return (command_type in command_rule_mapping
                and rule.name in command_rule_mapping[command_type])

    def _check_rule_conditions(self, rule: SafetyRule, context: SafetyContext) -> bool:
        try:
            return all(eval(cond, {'__builtins__': None}, {'context': context})
                       for cond in rule.conditions)
        except Exception as e:
            print(f'Error evaluating rule conditions: {e}')
            return False


# ----------------------------------------------------------------------------
# VMEM budgeting (generation-aware)
# ----------------------------------------------------------------------------
def _vmem_limit_bytes() -> int:
    """Scoped-VMEM budget: half of physical capacity, capped at 64 MiB.

    v5e/v6e (128 MiB physical) -> 64 MiB; v7x (64 MiB physical) -> 32 MiB.
    """
    try:
        cap = int(pltpu.get_tpu_info().vmem_capacity_bytes)
    except Exception:
        cap = 64 << 20          # conservative fallback (v7x per-TC VMEM)
    return min(cap // 2, 64 << 20)


def _pick_vocab_tile(V: int, rows: int, n_bufs: int, budget_bytes: int) -> int:
    """Largest vocab span (multiple of 1024 dividing V) whose pipelined f32
    footprint (n_bufs buffers of rows x TV) stays inside budget_bytes.
    No hard element cap: fewer, longer DMAs amortize the ~0.35 us/step cost."""
    tv = 1024
    while (V % (tv * 2) == 0
           and n_bufs * rows * (tv * 2) * 4 <= budget_bytes):
        tv *= 2
    return tv


# ----------------------------------------------------------------------------
# Pallas kernels
# ----------------------------------------------------------------------------
def _argmax_kernel(x_ref, out_ref, m_acc, c_acc):
    """Tiled per-row argmax over the vocab axis.

    x_ref : (BB, RB, 128) f32 tile of logits viewed as (B, V//128, 128)
    m_acc : (BB, 8, 128) f32 running per-(sublane, lane) max       (VMEM scratch)
    c_acc : (BB, 8, 128) i32 running per-(sublane, lane) chunk id  (VMEM scratch)

    Inner loop is 3 VALU ops/elem (cmp + 2 selects) — the per-cell index is
    only a scalar chunk id; the absolute index and the cross-lane/sublane
    reductions are reconstructed once in the epilogue.
    NaN logits are ignored (strict '>'); torch.argmax's NaN behavior differs —
    edge case only, not handled.
    """
    k = pl.program_id(1)
    BB, RB, L = x_ref.shape               # L == 128, RB % 8 == 0
    nchunks = RB // 8

    @pl.when(k == 0)
    def _():
        m_acc[...] = jnp.full_like(m_acc, _NEG_INF)
        c_acc[...] = jnp.zeros_like(c_acc)

    base_chunk = k * nchunks

    def body(r, carry):
        m, c = carry
        start = pl.multiple_of(r * 8, 8)
        xc = x_ref[:, pl.ds(start, 8), :]              # (BB, 8, 128)
        better = xc > m                                # strict >: first occurrence
        c = jnp.where(better, base_chunk + r, c)       # scalar chunk id select
        m = jnp.where(better, xc, m)
        return m, c

    m, c = lax.fori_loop(0, nchunks, body, (m_acc[...], c_acc[...]),
                         unroll=min(8, nchunks))
    m_acc[...] = m
    c_acc[...] = c

    @pl.when(k == pl.num_programs(1) - 1)
    def _():
        # One-time epilogue: rebuild absolute indices, then XLU reductions.
        sub = lax.broadcasted_iota(jnp.int32, (BB, 8, L), 1)
        lane = lax.broadcasted_iota(jnp.int32, (BB, 8, L), 2)
        absidx = c * _CHUNK + sub * L + lane
        gmax = jnp.max(jnp.max(m, axis=2, keepdims=True), axis=1, keepdims=True)
        cand = jnp.where(m == gmax, absidx, _INT32_MAX)   # min-index tie-break
        best = jnp.min(jnp.min(cand, axis=2, keepdims=True), axis=1, keepdims=True)
        out_ref[...] = best[..., 0]                       # (BB, 1)


def _filter_kernel(tile_has_ref, flags_ref, ids_ref, logits_ref, out_ref):
    """filtered = logits where (row is safe) or (token id in row's safe ids) else -inf.

    tile_has_ref : (n_tiles,) i32 in SMEM (scalar prefetch): 1 iff any safe id
                   falls inside this vocab tile.  Only those (<=K) tiles pay the
                   id-compare path; every other tile is a ~1 VPU-op/elem select.
    """
    k = pl.program_id(0)
    B, TV = logits_ref.shape
    x = logits_ref[...]
    keep_row = flags_ref[...] != 0                     # (B, 1) broadcasts over vocab
    neg = jnp.asarray(_NEG_INF, dtype=x.dtype)

    @pl.when(tile_has_ref[k] == 0)
    def _():                                           # hot path: plain row select
        out_ref[...] = jnp.where(keep_row, x, neg)

    @pl.when(tile_has_ref[k] != 0)
    def _():                                           # rare path: restore safe ids
        vidx = lax.broadcasted_iota(jnp.int32, (B, TV), 1) + k * TV
        ids = ids_ref[...]                             # (B, K), loaded once
        keep = keep_row
        for j in range(ids.shape[1]):                  # K is tiny (4)
            keep = keep | (vidx == ids[:, j:j + 1])
        out_ref[...] = jnp.where(keep, x, neg)


# ----------------------------------------------------------------------------
# Wrappers
# ----------------------------------------------------------------------------
def argmax_rows(logits: jax.Array) -> jax.Array:
    """Per-row argmax over vocab, returns (B, 1) int32 (first occurrence on ties)."""
    B, V = logits.shape
    if V % 1024 != 0:
        # TODO(synk): irregular vocab sizes fall back to XLA's argmax; the Pallas
        # path assumes the (B, V//128, 128) sublane-packed view tiles evenly.
        return jnp.argmax(logits, axis=-1).astype(jnp.int32)[:, None]
    # bf16/fp16 logits would violate the 8-sublane chunking assumption; the
    # cast to f32 is exact for argmax purposes.
    x = logits if logits.dtype == jnp.float32 else logits.astype(jnp.float32)
    BB = next(d for d in (8, 4, 2, 1) if B % d == 0)   # <=8 rows/block bounds live vregs
    vmem_limit = _vmem_limit_bytes()
    TV = _pick_vocab_tile(V, BB, n_bufs=2, budget_bytes=int(vmem_limit * 0.75))
    RB = TV // 128
    x3 = x.reshape(B, V // 128, 128)     # free contiguous view; packs vregs even for small B
    return pl.pallas_call(
        _argmax_kernel,
        out_shape=jax.ShapeDtypeStruct((B, 1), jnp.int32),
        grid=(B // BB, V // TV),
        in_specs=[pl.BlockSpec((BB, RB, 128), lambda b, k: (b, k, 0))],
        out_specs=pl.BlockSpec((BB, 1), lambda b, k: (b, 0)),
        scratch_shapes=[pltpu.VMEM((BB, 8, 128), jnp.float32),
                        pltpu.VMEM((BB, 8, 128), jnp.int32)],
        compiler_params=pltpu.CompilerParams(
            dimension_semantics=("parallel", "arbitrary"),
            vmem_limit_bytes=vmem_limit),
    )(x3)


def filter_logits(logits: jax.Array, safe_flags: jax.Array,
                  safe_ids: jax.Array) -> jax.Array:
    """Keep rows flagged safe; for unsafe rows keep only the listed safe ids (-inf else)."""
    B, V = logits.shape
    if V % 1024 != 0:
        # TODO(synk): irregular vocab -> plain XLA fallback (no Pallas tiling / budget check).
        vidx = jnp.arange(V, dtype=jnp.int32)
        keep = (safe_flags != 0) | (vidx[None, :, None] == safe_ids[:, None, :]).any(-1)
        return jnp.where(keep, logits, jnp.asarray(_NEG_INF, dtype=logits.dtype))

    vmem_limit = _vmem_limit_bytes()
    TV = _pick_vocab_tile(V, B, n_bufs=4, budget_bytes=int(vmem_limit * 0.75))
    n_tiles = V // TV

    # Per-tile "contains a safe id" table (host side; safe_ids is a tiny (B, K) array).
    ids_host = jax.device_get(safe_ids).tolist()
    tile_has_l = [0] * n_tiles
    for row in ids_host:
        for t in row:
            if 0 <= t < V:
                tile_has_l[t // TV] = 1
    tile_has = jnp.asarray(tile_has_l, dtype=jnp.int32)

    # TODO(synk): an unsafe-rows-only variant with input_output_aliases would cut
    # HBM traffic further, but without top-level buffer donation XLA inserts a
    # defensive full copy (and it conflicts with the reference clone semantics).
    return pl.pallas_call(
        _filter_kernel,
        out_shape=jax.ShapeDtypeStruct((B, V), logits.dtype),
        grid_spec=pltpu.PrefetchScalarGridSpec(
            num_scalar_prefetch=1,
            grid=(n_tiles,),
            in_specs=[pl.BlockSpec((B, 1), lambda k, th: (0, 0)),
                      pl.BlockSpec(safe_ids.shape, lambda k, th: (0, 0)),
                      pl.BlockSpec((B, TV), lambda k, th: (0, k))],
            out_specs=pl.BlockSpec((B, TV), lambda k, th: (0, k))),
        compiler_params=pltpu.CompilerParams(
            dimension_semantics=("parallel",),
            vmem_limit_bytes=vmem_limit),
    )(tile_has, safe_flags, safe_ids, logits)


# ----------------------------------------------------------------------------
# SafetyFilter forward (Pallas-backed)
# ----------------------------------------------------------------------------
class SafetyFilter:
    _MAX_SAFE_IDS = 4   # padded safe-alternative slots per row (-1 = empty)

    def __init__(self, safety_checker: AutomotiveSafetyChecker):
        self.safety_checker = safety_checker
        self.command_types = ['set_temperature', 'navigate_to', 'adjust_climate',
                              'activate_cruise_control', 'play_media']
        self.safe_alternatives = {'reduce_speed': [101, 345, 678],
                                  'disengage_autopilot': [202, 456, 789],
                                  'pull_over': [303, 567, 890]}

    def __call__(self, logits: jax.Array, input_ids: jax.Array,
                 context: SafetyContext) -> jax.Array:
        B, V = logits.shape
        # Pallas reduction kernel: per-row argmax (== torch.argmax(logits[i], -1)).
        # TODO(synk): this device->host sync plus the Python rule engine dominates
        # end-to-end latency at small B; no kernel-side fix exists for that.
        token_ids = jax.device_get(argmax_rows(logits))[:, 0]

        # Host-side (string/regex/rule) safety decisions -> per-row flag + safe ids.
        # TODO(synk): regex matching and python-eval of rule conditions have no
        # Pallas equivalent; they remain host-side exactly as in the reference.
        K = self._MAX_SAFE_IDS
        flags, ids, any_unsafe = [], [], False
        for i in range(B):
            cmd_idx = int(token_ids[i]) % len(self.command_types)
            command = f'{self.command_types[cmd_idx]} param=value'
            is_safe, violation = self.safety_checker.check_command_safety(command, context)
            row_ids = [-1] * K
            if is_safe:
                flags.append(1)
            else:
                any_unsafe = True
                flags.append(0)
                if violation and violation.rule in [r.name for r in self.safety_checker.rules]:
                    rule = next(r for r in self.safety_checker.rules
                                if r.name == violation.rule)
                    if rule.recovery_action:
                        alt = self.safe_alternatives.get(rule.recovery_action,
                                                         [404, 505, 606])[:K]
                        row_ids[:len(alt)] = alt
            ids.append(row_ids)

        if not any_unsafe:
            # All rows safe: filtered == clone of logits -> skip the filter kernel
            # entirely (zero extra HBM traffic on the common path).  Note: this
            # aliases rather than clones; safe because jax arrays are immutable.
            return logits

        safe_flags = jnp.asarray(flags, dtype=jnp.int32)[:, None]   # (B, 1)
        safe_ids = jnp.asarray(ids, dtype=jnp.int32)                # (B, K)
        # Pallas elementwise kernel: clone + -inf mask + restore safe ids,
        # streaming only logits (8 B/elem); id-compares confined to the few
        # vocab tiles that actually contain safe ids.
        return filter_logits(logits, safe_flags, safe_ids)


# ----------------------------------------------------------------------------
# Demo
# ----------------------------------------------------------------------------
if __name__ == "__main__":
    key = jax.random.PRNGKey(0)
    k_logits, k_big = jax.random.split(key)
    B, V, S = 2, 1024, 8

    logits = jax.random.normal(k_logits, (B, V), dtype=jnp.float32)
    input_ids = jnp.zeros((B, S), dtype=jnp.int32)   # unused, as in reference forward

    checker = AutomotiveSafetyChecker()
    safety_filter = SafetyFilter(checker)
    context = SafetyContext()

    # 1) Full forward pass. With the default checker and the hard-coded command
    #    templates every command is classified safe -> exact passthrough.
    out = jax.block_until_ready(safety_filter(logits, input_ids, context))
    assert out.shape == logits.shape and out.dtype == logits.dtype
    assert bool(jnp.array_equal(out, logits))

    # 2) Argmax kernel vs XLA reference (demo size + a multi-chunk, fully packed size).
    am = jax.block_until_ready(argmax_rows(logits))
    assert bool(jnp.array_equal(am[:, 0], jnp.argmax(logits, axis=-1).astype(jnp.int32)))

    big = jax.random.normal(k_big, (8, 16384), dtype=jnp.float32)
    am_big = jax.block_until_ready(argmax_rows(big))
    assert bool(jnp.array_equal(am_big[:, 0], jnp.argmax(big, axis=-1).astype(jnp.int32)))

    # 3) Filter kernel on a synthetic unsafe row (row 1 unsafe, safe ids 101/345/678),
    #    checked against a pure-jnp reference.
    flags_t = jnp.asarray([[1], [0]], dtype=jnp.int32)
    ids_t = jnp.asarray([[-1, -1, -1, -1], [101, 345, 678, -1]], dtype=jnp.int32)
    filt = jax.block_until_ready(filter_logits(logits, flags_t, ids_t))
    vidx = jnp.arange(V, dtype=jnp.int32)
    match = (vidx[None, :, None] == ids_t[:, None, :]).any(-1)
    keep = (flags_t != 0) | match
    ref = jnp.where(keep, logits, jnp.float32(_NEG_INF))
    assert bool(jnp.array_equal(filt, ref))

    print("KERNEL_OK")
</pallas_src>

<mosaic_0001>
module attributes {stable_mosaic.version = 11 : i64} {
  func.func @_argmax_kernel(%arg0: i32, %arg1: i32, %arg2: memref<2x8x128xf32, #tpu.memory_space<vmem>>, %arg3: memref<2x1xi32, #tpu.memory_space<vmem>>, %arg4: memref<2x8x128xf32, #tpu.memory_space<vmem>>, %arg5: memref<2x8x128xi32, #tpu.memory_space<vmem>>) attributes {dimension_semantics = [#tpu.dimension_semantics<parallel>, #tpu.dimension_semantics<arbitrary>], iteration_bounds = array<i64: 1, 1>, scalar_prefetch = 0 : i64, scratch_operands = 2 : i64, tpu.core_type = #tpu.core_type<tc>, window_params = [{transform_indices = @transform_0, window_bounds = array<i64: 2, 8, 128>}, {transform_indices = @transform_1, window_bounds = array<i64: 2, 1>}]} {
    %c0_i32 = arith.constant 0 : i32
    %0 = arith.cmpi eq, %arg1, %c0_i32 : i32
    %1 = arith.extui %0 : i1 to i32
    %c0_i32_0 = arith.constant 0 : i32
    %2 = arith.cmpi ne, %1, %c0_i32_0 : i32
    scf.if %2 {
      %cst = arith.constant 0xFF800000 : f32
      %20 = vector.broadcast %cst : f32 to vector<2x8x128xf32>
      %c0_18 = arith.constant 0 : index
      %c0_19 = arith.constant 0 : index
      %c0_20 = arith.constant 0 : index
      %21 = vector.load %arg4[%c0_18, %c0_19, %c0_20] : memref<2x8x128xf32, #tpu.memory_space<vmem>>, vector<2x8x128xf32>
      tpu.vector_store %arg4[%c0_18, %c0_19, %c0_20], %20 {strides = array<i32>} : memref<2x8x128xf32, #tpu.memory_space<vmem>>, vector<2x8x128xf32>,
      %c0_i32_21 = arith.constant 0 : i32
      %22 = vector.broadcast %c0_i32_21 : i32 to vector<2x8x128xi32>
      %c0_22 = arith.constant 0 : index
      %c0_23 = arith.constant 0 : index
      %c0_24 = arith.constant 0 : index
      %23 = vector.load %arg5[%c0_22, %c0_23, %c0_24] : memref<2x8x128xi32, #tpu.memory_space<vmem>>, vector<2x8x128xi32>
      tpu.vector_store %arg5[%c0_22, %c0_23, %c0_24], %22 {strides = array<i32>} : memref<2x8x128xi32, #tpu.memory_space<vmem>>, vector<2x8x128xi32>,
    } else {
    }
    %c1_i32 = arith.constant 1 : i32
    %3 = arith.muli %arg1, %c1_i32 : i32
    %c0 = arith.constant 0 : index
    %c0_1 = arith.constant 0 : index
    %c0_2 = arith.constant 0 : index
    %4 = vector.load %arg4[%c0, %c0_1, %c0_2] : memref<2x8x128xf32, #tpu.memory_space<vmem>>, vector<2x8x128xf32>
    %c0_3 = arith.constant 0 : index
    %c0_4 = arith.constant 0 : index
    %c0_5 = arith.constant 0 : index
    %5 = vector.load %arg5[%c0_3, %c0_4, %c0_5] : memref<2x8x128xi32, #tpu.memory_space<vmem>>, vector<2x8x128xi32>
    %c0_i32_6 = arith.constant 0 : i32
    %c8_i32 = arith.constant 8 : i32
    %6 = arith.muli %c0_i32_6, %c8_i32 : i32
    %7 = tpu.assume_multiple %6, 8 : i32
    %c0_7 = arith.constant 0 : index
    %8 = arith.index_cast %7 : i32 to index
    %c0_8 = arith.constant 0 : index
    %9 = vector.load %arg2[%c0_7, %8, %c0_8] : memref<2x8x128xf32, #tpu.memory_space<vmem>>, vector<2x8x128xf32>
    %10 = arith.cmpf ogt, %9, %4 : vector<2x8x128xf32>
    %11 = arith.addi %3, %c0_i32_6 : i32
    %12 = vector.broadcast %11 : i32 to vector<2x8x128xi32>
    %13 = arith.select %10, %12, %5 : vector<2x8x128xi1>, vector<2x8x128xi32>
    %14 = arith.select %10, %9, %4 : vector<2x8x128xi1>, vector<2x8x128xf32>
    %c1_i32_9 = arith.constant 1 : i32
    %c0_10 = arith.constant 0 : index
    %c0_11 = arith.constant 0 : index
    %c0_12 = arith.constant 0 : index
    %15 = vector.load %arg4[%c0_10, %c0_11, %c0_12] : memref<2x8x128xf32, #tpu.memory_space<vmem>>, vector<2x8x128xf32>
    tpu.vector_store %arg4[%c0_10, %c0_11, %c0_12], %14 {strides = array<i32>} : memref<2x8x128xf32, #tpu.memory_space<vmem>>, vector<2x8x128xf32>,
    %c0_13 = arith.constant 0 : index
    %c0_14 = arith.constant 0 : index
    %c0_15 = arith.constant 0 : index
    %16 = vector.load %arg5[%c0_13, %c0_14, %c0_15] : memref<2x8x128xi32, #tpu.memory_space<vmem>>, vector<2x8x128xi32>
    tpu.vector_store %arg5[%c0_13, %c0_14, %c0_15], %13 {strides = array<i32>} : memref<2x8x128xi32, #tpu.memory_space<vmem>>, vector<2x8x128xi32>,
    %c0_i32_16 = arith.constant 0 : i32
    %17 = arith.cmpi eq, %arg1, %c0_i32_16 : i32
    %18 = arith.extui %17 : i1 to i32
    %c0_i32_17 = arith.constant 0 : i32
    %19 = arith.cmpi ne, %18, %c0_i32_17 : i32
    scf.if %19 {
      %20 = tpu.iota {dimensions = array<i32: 1>} : vector<2x8x128xi32>
      %21 = tpu.iota {dimensions = array<i32: 2>} : vector<2x8x128xi32>
      %c1024_i32 = arith.constant 1024 : i32
      %22 = vector.broadcast %c1024_i32 : i32 to vector<2x8x128xi32>
      %23 = arith.muli %13, %22 : vector<2x8x128xi32>
      %c128_i32 = arith.constant 128 : i32
      %24 = vector.broadcast %c128_i32 : i32 to vector<2x8x128xi32>
      %25 = arith.muli %20, %24 : vector<2x8x128xi32>
      %26 = arith.addi %23, %25 : vector<2x8x128xi32>
      %27 = arith.addi %26, %21 : vector<2x8x128xi32>
      %cst = arith.constant dense<0xFF800000> : vector<2x8xf32>
      %28 = vector.multi_reduction <maximumf>, %14, %cst [2] : vector<2x8x128xf32> to vector<2x8xf32>
      %29 = vector.shape_cast %28 : vector<2x8xf32> to vector<2x8x1xf32>
      %cst_18 = arith.constant dense<0xFF800000> : vector<2x1xf32>
      %30 = vector.multi_reduction <maximumf>, %29, %cst_18 [1] : vector<2x8x1xf32> to vector<2x1xf32>
      %31 = vector.shape_cast %30 : vector<2x1xf32> to vector<2x1x1xf32>
      %32 = vector.broadcast %31 : vector<2x1x1xf32> to vector<2x8x128xf32>
      %33 = arith.cmpf oeq, %14, %32 : vector<2x8x128xf32>
      %c2147483647_i32 = arith.constant 2147483647 : i32
      %34 = vector.broadcast %c2147483647_i32 : i32 to vector<2x8x128xi32>
      %35 = arith.select %33, %27, %34 : vector<2x8x128xi1>, vector<2x8x128xi32>
      %cst_19 = arith.constant dense<2147483647> : vector<2x8xi32>
      %36 = vector.multi_reduction <minsi>, %35, %cst_19 [2] : vector<2x8x128xi32> to vector<2x8xi32>
      %37 = vector.shape_cast %36 : vector<2x8xi32> to vector<2x8x1xi32>
      %cst_20 = arith.constant dense<2147483647> : vector<2x1xi32>
      %38 = vector.multi_reduction <minsi>, %37, %cst_20 [1] : vector<2x8x1xi32> to vector<2x1xi32>
      %39 = vector.shape_cast %38 : vector<2x1xi32> to vector<2x1x1xi32>
      %40 = vector.shape_cast %39 : vector<2x1x1xi32> to vector<2x1xi32>
      %c0_21 = arith.constant 0 : index
      %c0_22 = arith.constant 0 : index
      %41 = vector.load %arg3[%c0_21, %c0_22] : memref<2x1xi32, #tpu.memory_space<vmem>>, vector<2x1xi32>
      tpu.vector_store %arg3[%c0_21, %c0_22], %40 {strides = array<i32>} : memref<2x1xi32, #tpu.memory_space<vmem>>, vector<2x1xi32>,
    } else {
    }
    return
  }
  func.func @transform_0(%arg0: i32, %arg1: i32) -> (i32, i32, i32) {
    %c0_i32 = arith.constant 0 : i32
    %c0_i32_0 = arith.constant 0 : i32
    return %arg0, %arg1, %c0_i32 : i32, i32, i32
  }
  func.func @transform_1(%arg0: i32, %arg1: i32) -> (i32, i32) {
    %c0_i32 = arith.constant 0 : i32
    %c0_i32_0 = arith.constant 0 : i32
    return %arg0, %c0_i32 : i32, i32
  }
}

</mosaic_0001>

<bundles_post_ra>
// kernel: tpu_custom_call.1
= control target key start
LH: loop header
LB: loop body
LE: loop exit
PB: predicated region body
PF: predicated region fallthrough
CT: control target
= control target key end

     0   :  { %6 = vsyncpa [#allocation5], 0  ;;  %s161_s6 = smov [#allocation4]   ;;  %s180_s0 = inlined_call_operand.hbm [shape: f32[2,8,128], index: 0, kind: input, shape index: {}]   ;;  %s181_s1 = inlined_call_operand.vmem [shape: s32[2,1], index: 1, kind: output, shape index: {}]  }
   0x1   :  { %s12_s7 = sshll.u32 %s161_s6, 4  ;;  %s13_s7 = int_to_ptr.vmem [resolvable:$true] %s12_s7 }
   0x2   :  { %s147_s8 = scalar_lea.vmem %s13_s7, 256  ;;  %p152_p1 = scmp.lt.s32.totalorder %s13_s7, %s13_s7 }
   0x3   :  { %p148_p0 = scmp.ne.s32.totalorder %s13_s7, %s147_s8  ;;  %p153_p2 = scmp.lt.s32.totalorder %s147_s8, %s147_s8 }
   0x5   :  { %p154_p3 = por %p153_p2, %p152_p1 }
   0x7   :  { %p155_p4 = pnand %p154_p3, %p148_p0 }
   0x9   :  { %158 = shalt.err (!%p155_p4)
}
   0xa   :  { %s162_s9 = smov 128   ;;  %s163_s10 = smov 8  }
   0xb   :  { %18 = dma.hbm_to_vmem [thread:$0]  %s180_s0, 256, %s13_s7, [#allocation5], %s162_s9, %s162_s9, %s163_s10  }
   0xc   :  { %159 = dma.done.wait [#allocation5], 256  }
   0xd   :  { %160 = vsyncadd [#allocation5], 4294967040  ;;  %v34_v0 = vld [vmem:[#allocation4] sm:$0xff]  ;;  %v35_v1 = vld [vmem:[#allocation4 + $0x8] sm:$0xff]  ;;  %v50_v4 = vlaneseq  ;;  %vm127_vm11 = vcmask 1041409   ;;  %vm129_vm12 = vcmask 1024  }
   0xe   :  { %vm36_vm0 = vcmp.gt.f32.partialorder %v34_v0, -inf  ;;  %vm37_vm1 = vcmp.gt.f32.partialorder %v35_v1, -inf }
   0xf   :  { %v41_v2 = vsel %vm36_vm0, %v34_v0, -inf  ;;  %v42_v3 = vsel %vm37_vm1, %v35_v1, -inf  ;;  %v51_v7 = vshrl.u32 %v50_v4, 7  ;;  %v53_v12 = vand.u32 127, %v50_v4 }
  0x10   :  { %61 = vmax.xlane.f32.xlu0 %v41_v2 }
  0x11   :  { %v56_v13 = vmul.u32 128, %v51_v7 }
  0x13   :  { %v59_v18 = vadd.s32 %v56_v13, %v53_v12 }
  0x14   :  { %63 = vmax.xlane.f32.xlu0 %v42_v3 }
  0x99   :  { %v62_v5 = vpop.xlane.xlu0 %61 }
  0x9a   :  { %v65_v6 = vrot.slane %v62_v5, 4 }
  0x9c   :  { %v66_v8 = vmax.f32 %v62_v5, %v65_v6 }
  0x9d   :  { %v64_v9 = vpop.xlane.xlu0 %63 }
  0x9e   :  { %v67_v10 = vrot.slane %v66_v8, 2  ;;  %v71_v11 = vrot.slane %v64_v9, 4 }
  0xa0   :  { %v68_v14 = vmax.f32 %v66_v8, %v67_v10  ;;  %v72_v15 = vmax.f32 %v64_v9, %v71_v11 }
  0xa2   :  { %v69_v16 = vrot.slane %v68_v14, 1  ;;  %v73_v17 = vrot.slane %v72_v15, 2 }
  0xa4   :  { %v70_v19 = vmax.f32 %v68_v14, %v69_v16  ;;  %v74_v20 = vmax.f32 %v72_v15, %v73_v17 }
  0xa6   :  { %v75_v21 = vrot.slane %v74_v20, 1  ;;  %vm77_vm2 = vcmp.eq.f32.partialorder %v41_v2, %v70_v19 }
  0xa7   :  { %v79_v22 = vsel %vm77_vm2, %v59_v18, 2147483647 }
  0xa8   :  { %v76_v23 = vmax.f32 %v74_v20, %v75_v21  ;;  %v82_v24 = vshra.s32 %v79_v22, 16  ;;  %v81_v29 = vand.u32 65535, %v79_v22 }
  0xaa   :  { %v84_v25 = vcvt.s32.f32 %v82_v24  ;;  %vm78_vm3 = vcmp.eq.f32.partialorder %v42_v3, %v76_v23  ;;  %v83_v31 = vcvt.s32.f32 %v81_v29 }
  0xab   :  { %v80_v26 = vsel %vm78_vm3, %v59_v18, 2147483647 }
  0xac   :  { %85 = vmin.xlane.f32.xlu1 %v84_v25  ;;  %v96_v27 = vshra.s32 %v80_v26, 16  ;;  %v95_v32 = vand.u32 65535, %v80_v26 }
  0xae   :  { %v98_v28 = vcvt.s32.f32 %v96_v27  ;;  %v97_v35 = vcvt.s32.f32 %v95_v32 }
  0xb0   :  { %99 = vmin.xlane.f32.xlu1 %v98_v28 }
 0x135   :  { %v86_v30 = vpop.xlane.xlu1 %85 }
 0x136   :  { %vm87_vm4 = vcmp.eq.f32.partialorder %v84_v25, %v86_v30  ;;  %v92_v37 = vcvt.f32.s32 %v86_v30 }
 0x137   :  { %v88_v33 = vsel %vm87_vm4, %v83_v31, inf }
 0x138   :  { %89 = vmin.xlane.f32.xlu0 %v88_v33  ;;  %v93_v39 = vshll.u32 %v92_v37, 16 }
 0x139   :  { %v100_v34 = vpop.xlane.xlu1 %99 }
 0x13a   :  { %vm101_vm5 = vcmp.eq.f32.partialorder %v98_v28, %v100_v34  ;;  %v106_v40 = vcvt.f32.s32 %v100_v34 }
 0x13b   :  { %v102_v36 = vsel %vm101_vm5, %v97_v35, inf }
 0x13c   :  { %103 = vmin.xlane.f32.xlu1 %v102_v36  ;;  %v107_v44 = vshll.u32 %v106_v40, 16 }
 0x1c1   :  { %v90_v38 = vpop.xlane.xlu0 %89 }
 0x1c2   :  { %v91_v41 = vcvt.f32.s32 %v90_v38 }
 0x1c4   :  { %v94_v42 = vadd.s32 %v93_v39, %v91_v41 }
 0x1c5   :  { %v104_v43 = vpop.xlane.xlu1 %103 }
 0x1c6   :  { %v109_v45 = vrot.slane %v94_v42, 4  ;;  %v105_v46 = vcvt.f32.s32 %v104_v43 }
 0x1c8   :  { %vm110_vm6 = vcmp.lt.s32.totalorder %v94_v42, %v109_v45  ;;  %v108_v47 = vadd.s32 %v107_v44, %v105_v46 }
 0x1c9   :  { %v111_v48 = vsel %vm110_vm6, %v94_v42, %v109_v45 }
 0x1ca   :  { %v112_v49 = vrot.slane %v111_v48, 2  ;;  %v118_v50 = vrot.slane %v108_v47, 4 }
 0x1cc   :  { %vm113_vm7 = vcmp.lt.s32.totalorder %v111_v48, %v112_v49  ;;  %vm119_vm8 = vcmp.lt.s32.totalorder %v108_v47, %v118_v50 }
 0x1cd   :  { %v114_v51 = vsel %vm113_vm7, %v111_v48, %v112_v49  ;;  %v120_v52 = vsel %vm119_vm8, %v108_v47, %v118_v50 }
 0x1ce   :  { %v115_v53 = vrot.slane %v114_v51, 1  ;;  %v121_v54 = vrot.slane %v120_v52, 2 }
 0x1d0   :  { %vm122_vm9 = vcmp.lt.s32.totalorder %v120_v52, %v121_v54  ;;  %vm116_vm10 = vcmp.lt.s32.totalorder %v114_v51, %v115_v53 }
 0x1d1   :  { %v123_v55 = vsel %vm122_vm9, %v120_v52, %v121_v54  ;;  %v117_v57 = vsel %vm116_vm10, %v114_v51, %v115_v53 }
 0x1d2   :  { %v124_v56 = vrot.slane %v123_v55, 1 }
 0x1d4   :  { %vm125_vm13 = vcmp.lt.s32.totalorder %v123_v55, %v124_v56 }
 0x1d5   :  { %v126_v58 = vsel %vm125_vm13, %v123_v55, %v124_v56 }
 0x1d6   :  { %v128_v59 = vsel %vm127_vm11, %v126_v58, %v117_v57 }
 0x1d7   :  { %130 = vst.msk [vmem:[%s181_s1] sm:$0x3] %vm129_vm12, %v128_v59 }
 0x1d8   :  { %135 = vsyncpa [#allocation5], 1 }

</bundles_post_ra>
